<compile_context>
chip_gen: v5e
topology: v5e:2x2
jax: 0.10.0
libtpu: 0.0.40
codegen_flags: <defaults>
</compile_context>

<pallas_src>
import functools
import warnings

import jax
import jax.numpy as jnp
from jax import lax
from jax.experimental import pallas as pl
from jax.experimental.pallas import tpu as pltpu

# Donation through the bitcast reshapes / custom-call aliases below is expected
# to be honoured; if a particular XLA build declines, the only consequence is a
# defensive copy — silence the (harmless) advisory warning so runs stay clean.
warnings.filterwarnings("ignore", message="Some donated buffers were not usable")


# -----------------------------------------------------------------------------
# Kernels
# -----------------------------------------------------------------------------
def _passthrough_kernel(x_ref, o_ref):
    # Single scalar copy on the scalar unit (SMEM sld/sst): no vector tiles,
    # no (8,128) padding, no masked stores.
    o_ref[0] = x_ref[0]


def _ring_record_kernel(idx_ref, x_ref, buf_ref, out_ref):
    # Scatter one f32 scalar into flat slot `idx` of the ring buffer.
    # idx / x live in SMEM (scalar unit); the ring is one small VMEM tile.
    # The full tile is rewritten (select against an iota mask), so the
    # HBM-aliased output is always fully defined — no partial-store hazards.
    rows, cols = out_ref.shape
    row_ids = lax.broadcasted_iota(jnp.int32, (rows, cols), 0)
    col_ids = lax.broadcasted_iota(jnp.int32, (rows, cols), 1)
    lin = row_ids * cols + col_ids
    out_ref[...] = jnp.where(lin == idx_ref[0], x_ref[0], buf_ref[...])


# -----------------------------------------------------------------------------
# Wrappers
# -----------------------------------------------------------------------------
def simple_forward(x):
    """Simple.forward fast path: identity -> no kernel, zero device overhead."""
    return x


@functools.partial(jax.jit, donate_argnums=(0,))
def simple_forward_pallas(x):
    """Optional Pallas fusion-anchor identity on a 1-element array.

    Jitted + donated so the reshapes lower to bitcasts and input_output_aliases
    reuses the input HBM buffer.  NOTE: the caller's `x` is consumed (donated).
    """
    orig_shape = x.shape
    x_flat = x.reshape((1,))  # flat 1-D scalar: SMEM-friendly, no (8,128) padding
    y_flat = pl.pallas_call(
        _passthrough_kernel,
        out_shape=jax.ShapeDtypeStruct((1,), x_flat.dtype),
        in_specs=[pl.BlockSpec(memory_space=pltpu.MemorySpace.SMEM)],
        out_specs=pl.BlockSpec(memory_space=pltpu.MemorySpace.SMEM),
        input_output_aliases={0: 0},
        cost_estimate=pl.CostEstimate(flops=0, transcendentals=0, bytes_accessed=8),
    )(x_flat)
    return y_flat.reshape(orig_shape)


@functools.partial(jax.jit, donate_argnums=(0,))
def _ring_record(ring, idx, x):
    """ring.flat[idx] <- float32(x), in place (ring is donated & HBM-aliased)."""
    x_f32 = x.reshape((1,)).astype(jnp.float32)
    idx_i32 = idx.reshape((1,)).astype(jnp.int32)
    return pl.pallas_call(
        _ring_record_kernel,
        out_shape=jax.ShapeDtypeStruct(ring.shape, ring.dtype),
        in_specs=[
            pl.BlockSpec(memory_space=pltpu.MemorySpace.SMEM),   # idx
            pl.BlockSpec(memory_space=pltpu.MemorySpace.SMEM),   # x
            pl.BlockSpec(memory_space=pltpu.MemorySpace.VMEM),   # ring
        ],
        out_specs=pl.BlockSpec(memory_space=pltpu.MemorySpace.VMEM),
        input_output_aliases={2: 0},                             # ring -> out
        cost_estimate=pl.CostEstimate(
            flops=0, transcendentals=0,
            bytes_accessed=2 * ring.size * ring.dtype.itemsize + 8),
    )(idx_i32, x_f32, ring)


# -----------------------------------------------------------------------------
# Module
# -----------------------------------------------------------------------------
class SimplePallas:
    """JAX/Pallas stand-in for the mlogger `Simple` module (no parameters)."""

    LANES = 128  # ring rows are 128 lanes wide (lane-aligned f32 tile)

    def __init__(self, plot_title="loss", use_pallas_anchor=False, ring_slots=1024):
        self.plot_title = plot_title
        self.chart_x_axis = "time"
        self.chart_y_axis = ""
        self._val = None
        self._history = []            # one entry per forward(), in call order
        self._use_pallas_anchor = use_pallas_anchor
        rows = max(1, -(-int(ring_slots) // self.LANES))
        self._ring_slots = rows * self.LANES
        self._ring = jnp.zeros((rows, self.LANES), dtype=jnp.float32)
        self._n_pending = 0
        # TODO(synk): mlogger channel creation / channel.update(time, value) is a
        # host-side logging side effect with no Pallas/JAX equivalent; flushed
        # values are appended to self._history instead.

    # -- logging ---------------------------------------------------------------
    def update(self, val):
        self._val = float(val)
        self._history.append(self._val)

    def flush(self):
        """Drain buffered per-step scalars: ONE device->host copy covers up to
        `ring_slots` forward calls (instead of one 4-byte sync per call)."""
        if self._n_pending == 0:
            return
        host = jax.device_get(self._ring).reshape(-1)
        for v in host[: self._n_pending]:
            self.update(v)            # exactly one update per forward, in order
        self._n_pending = 0

    @property
    def value(self):
        self.flush()
        return self._val

    # -- forward ---------------------------------------------------------------
    def forward(self, x):
        y = simple_forward_pallas(x) if self._use_pallas_anchor else simple_forward(x)
        # Mirrors `self.update(x.item())` without a per-step host sync: record
        # the scalar into the device-side ring; it is resolved (in order) by
        # flush()/.value, or automatically when the ring is full.
        idx = jnp.asarray(self._n_pending, dtype=jnp.int32)
        self._ring = _ring_record(self._ring, idx, y)
        self._n_pending += 1
        if self._n_pending == self._ring_slots:
            self.flush()
        return y

    __call__ = forward


# -----------------------------------------------------------------------------
# Demo / correctness check
# -----------------------------------------------------------------------------
if __name__ == "__main__":
    key = jax.random.PRNGKey(0)
    n_steps = 130                      # crosses one ring wrap when ring_slots=128
    xs = jax.random.normal(key, (n_steps, 1, 1), dtype=jnp.float32)
    expected = [float(v) for v in jax.device_get(xs).reshape(n_steps)]

    # 1) Default (recommended) path: identity is a no-op; per-step logging goes
    #    through the Pallas ring-record kernel and is drained in batches.
    mod = SimplePallas(plot_title="demo", ring_slots=128)
    y = None
    for i in range(n_steps):
        y = mod(xs[i])
        assert y.shape == (1, 1) and y.dtype == jnp.float32
    jax.block_until_ready(y)
    assert abs(float(jax.device_get(y).reshape(())) - expected[-1]) < 1e-6
    assert abs(mod.value - expected[-1]) < 1e-6          # latest value, like torch
    assert len(mod._history) == n_steps                  # one update per forward
    assert all(abs(a - b) < 1e-6 for a, b in zip(mod._history, expected))

    # 2) Optional Pallas fusion-anchor identity: run once and verify.
    #    (The anchor donates its input, so hand it a dedicated buffer.)
    mod_k = SimplePallas(plot_title="demo_anchor", use_pallas_anchor=True)
    x2 = xs[0] + 0.0
    y_k = mod_k(x2)
    jax.block_until_ready(y_k)
    assert y_k.shape == (1, 1) and y_k.dtype == jnp.float32
    assert abs(float(jax.device_get(y_k).reshape(())) - expected[0]) < 1e-6
    assert abs(mod_k.value - expected[0]) < 1e-6

    print("KERNEL_OK")
</pallas_src>

<mosaic_0001>
module attributes {stable_mosaic.version = 11 : i64} {
  func.func @_ring_record_kernel(%arg0: memref<1xi32, #tpu.memory_space<smem>>, %arg1: memref<1xf32, #tpu.memory_space<smem>>, %arg2: memref<1x128xf32, #tpu.memory_space<vmem>>, %arg3: memref<1x128xf32, #tpu.memory_space<vmem>>) attributes {dimension_semantics = [], scalar_prefetch = 0 : i64, scratch_operands = 0 : i64, tpu.core_type = #tpu.core_type<tc>} {
    %0 = tpu.iota {dimensions = array<i32: 0>} : vector<1x128xi32>
    %1 = tpu.iota {dimensions = array<i32: 1>} : vector<1x128xi32>
    %c128_i32 = arith.constant 128 : i32
    %2 = vector.broadcast %c128_i32 : i32 to vector<1x128xi32>
    %3 = arith.muli %0, %2 : vector<1x128xi32>
    %4 = arith.addi %3, %1 : vector<1x128xi32>
    %c0 = arith.constant 0 : index
    %5 = memref.load %arg0[%c0] : memref<1xi32, #tpu.memory_space<smem>>
    %6 = vector.broadcast %5 : i32 to vector<1x128xi32>
    %7 = arith.cmpi eq, %4, %6 : vector<1x128xi32>
    %c0_0 = arith.constant 0 : index
    %8 = memref.load %arg1[%c0_0] : memref<1xf32, #tpu.memory_space<smem>>
    %c0_1 = arith.constant 0 : index
    %c0_2 = arith.constant 0 : index
    %9 = vector.load %arg2[%c0_1, %c0_2] : memref<1x128xf32, #tpu.memory_space<vmem>>, vector<1x128xf32>
    %10 = vector.broadcast %8 : f32 to vector<1x128xf32>
    %11 = arith.select %7, %10, %9 : vector<1x128xi1>, vector<1x128xf32>
    %c0_3 = arith.constant 0 : index
    %c0_4 = arith.constant 0 : index
    %12 = vector.load %arg3[%c0_3, %c0_4] : memref<1x128xf32, #tpu.memory_space<vmem>>, vector<1x128xf32>
    tpu.vector_store %arg3[%c0_3, %c0_4], %11 {strides = array<i32>} : memref<1x128xf32, #tpu.memory_space<vmem>>, vector<1x128xf32>,
    return
  }
}

</mosaic_0001>

<bundles_post_ra>
// kernel: _ring_record.1
= control target key start
LH: loop header
LB: loop body
LE: loop exit
PB: predicated region body
PF: predicated region fallthrough
CT: control target
= control target key end

     0   :  { %10 = vsyncpa [#allocation5], 0  ;;  %s150_s0 = inlined_call_operand.<no memory space> [shape: s32[1], index: 0, kind: input, shape index: {}]   ;;  %s151_s1 = inlined_call_operand.<no memory space> [shape: f32[1], index: 1, kind: input, shape index: {}]   ;;  %s152_s2 = inlined_call_operand.hbm [shape: f32[1,128], index: 2, kind: input, shape index: {}, may-alias: {2,3}]   ;;  %s153_s3 = inlined_call_operand.hbm [shape: f32[1,128], index: 3, kind: output, shape index: {}, may-alias: {2,3}]  }
   0x1   :  { %11 = vsyncpa [#allocation6], 0  ;;  %s21_s14 = sshll.u32 %s152_s2, 4  ;;  %s116_s15 = smov [#allocation4]   ;;  %s22_s14 = int_to_ptr.hbm [resolvable:$true] %s21_s14 }
   0x2   :  { %s23_s16 = sshll.u32 %s116_s15, 4  ;;  %s24_s16 = int_to_ptr.vmem [resolvable:$true] %s23_s16 }
   0x3   :  { %26 = dma.hbm_to_vmem [thread:$0]  %s22_s14, 16, %s24_s16, [#allocation5]  }
   0x4   :  { %112 = dma.done.wait [#allocation5], 16  }
   0x5   :  { %113 = vsyncadd [#allocation5], 4294967280  ;;  %v31_v0 = vlaneseq  ;;  %v38_v4 = vstv %s150_s0  ;;  %s117_s19 = smov [#allocation7]   ;;  %s52_s2 = sshll.u32 %s153_s3, 4  ;;  %v42_v6 = vstv %s151_s1  ;;  %v41_v7 = vld [vmem:[#allocation4] sm:$0x1]  ;;  %s53_s2 = int_to_ptr.hbm [resolvable:$true] %s52_s2 }
   0x6   :  { %s50_s20 = sshll.u32 %s117_s19, 4  ;;  %s51_s20 = int_to_ptr.vmem [resolvable:$true] %s50_s20 }
   0x7   :  { %v32_v1 = vshrl.u32 %v31_v0, 7  ;;  %v34_v2 = vand.u32 127, %v31_v0 }
   0x9   :  { %v35_v3 = vmul.u32 128, %v32_v1 }
   0xb   :  { %v36_v5 = vadd.s32 %v35_v3, %v34_v2 }
   0xd   :  { %vm39_vm0 = vcmp.eq.s32.totalorder %v36_v5, %v38_v4 }
   0xe   :  { %v43_v8 = vsel %vm39_vm0, %v42_v6, %v41_v7 }
   0xf   :  { %44 = vst [vmem:[#allocation7] sm:$0x1] %v43_v8 }
  0x10   :  { %55 = dma.vmem_to_hbm [thread:$0]  %s51_s20, 16, %s53_s2, [#allocation6]  }
  0x11   :  { %114 = dma.done.wait [#allocation6], 16  }
  0x12   :  { %115 = vsyncadd [#allocation6], 4294967280 }
  0x13   :  { %60 = vsyncpa [#allocation5], 1 }
  0x14   :  { %61 = vsyncpa [#allocation6], 1 }

</bundles_post_ra>
